<compile_context>
chip_gen: v5e
topology: v5e:2x2
jax: 0.10.0
libtpu: 0.0.40
codegen_flags: <defaults>
</compile_context>

<pallas_src>
import functools
import math

import jax
import jax.numpy as jnp
from jax.experimental import pallas as pl
from jax.experimental.pallas import tpu as pltpu


def _transformer_layer_kernel(
    x_ref,      # (L, NB*C) f32   lane-dense slab holding NB batch elements
    wqkv_ref,   # (C, 3C)   bf16  fused (q/k/v Linear) o (MHA in_proj), pre-transposed,
                #                 q third pre-scaled by 1/sqrt(Dh)
    bqkv_ref,   # (1, 3C)   f32   in_proj bias (q third pre-scaled)
    wo_ref,     # (C, C)    bf16  out_proj.weight.T
    bo_ref,     # (1, C)    f32   out_proj.bias
    w1_ref,     # (C, C)    bf16  fc1.weight.T
    w2_ref,     # (C, C)    bf16  fc2.weight.T
    o_ref,      # (L, NB*C)       same layout as x_ref
    x2_ref,     # VMEM (NB*L, C) f32 scratch: batch-major input rows
    attn_ref,   # VMEM (NB*L, C) f32 scratch: attention output rows
    *,
    num_heads: int,
):
    L = x_ref.shape[0]
    C = x2_ref.shape[1]
    NB = x_ref.shape[1] // C
    H = num_heads
    Dh = C // H

    # ---- gather NB batch elements into batch-major rows (R, C): every projection /
    #      FFN matmul then runs with M = NB*L rows instead of M = L. ----
    for n in range(NB):
        x2_ref[n * L:(n + 1) * L, :] = x_ref[:, n * C:(n + 1) * C]

    xb = x2_ref[...].astype(jnp.bfloat16)

    # ---- fused q/k/v -> in_proj: one (R, C) x (C, 3C) bf16 matmul, f32 accumulation ----
    qkv = jnp.dot(xb, wqkv_ref[...], preferred_element_type=jnp.float32) + bqkv_ref[...]
    qkv_b = qkv.astype(jnp.bfloat16)

    # ---- scaled-dot-product attention (f32 softmax), per (batch element, head).
    #      Head outputs go straight into a lane-dense (R, C) scratch, so there is no
    #      lane-axis concatenate and out_proj is one big matmul afterwards. ----
    trans_b = (((1,), (1,)), ((), ()))   # contract both operands on their last dim
    for n in range(NB):
        rows = slice(n * L, (n + 1) * L)
        for h in range(H):
            q = qkv_b[rows, h * Dh:(h + 1) * Dh]                   # (L, Dh), pre-scaled
            k = qkv_b[rows, C + h * Dh:C + (h + 1) * Dh]           # (L, Dh)
            v = qkv_b[rows, 2 * C + h * Dh:2 * C + (h + 1) * Dh]   # (L, Dh)
            s = jax.lax.dot_general(
                q, k, trans_b, preferred_element_type=jnp.float32)  # (L, L)
            s = s - jnp.max(s, axis=-1, keepdims=True)
            p = jnp.exp(s)
            p = p * pl.reciprocal(jnp.sum(p, axis=-1, keepdims=True), approx=True)
            attn_ref[rows, h * Dh:(h + 1) * Dh] = jnp.dot(
                p.astype(jnp.bfloat16), v, preferred_element_type=jnp.float32)

    # ---- out_proj + residual (f32) ----
    attn = attn_ref[...].astype(jnp.bfloat16)
    out = jnp.dot(attn, wo_ref[...], preferred_element_type=jnp.float32) + bo_ref[...]
    r1 = out + x2_ref[...]

    # ---- feed-forward fc2(fc1(x)) (bias-free) + residual ----
    h1 = jnp.dot(r1.astype(jnp.bfloat16), w1_ref[...],
                 preferred_element_type=jnp.float32)
    r2 = jnp.dot(h1.astype(jnp.bfloat16), w2_ref[...],
                 preferred_element_type=jnp.float32) + r1

    # ---- scatter batch-major rows back to the lane-dense output slab ----
    for n in range(NB):
        o_ref[:, n * C:(n + 1) * C] = r2[n * L:(n + 1) * L, :].astype(o_ref.dtype)


def _pick_batch_block(n, l, c):
    """How many batch elements to fold into one grid step (targets >=128 matmul rows),
    while keeping the flattened lane-dense block shape legal (multiple of 128 or full)."""
    target = max(1, 128 // max(l, 1))
    nb = min(n, target)
    while nb > 1 and not (n % nb == 0 and (nb == n or (nb * c) % 128 == 0)):
        nb -= 1
    if nb == 1 and n > 1 and (c % 128) != 0 and n * l * c * 4 <= (4 << 20):
        nb = n   # fall back to the full batch so the block lane dim equals the array dim
    return nb


def transformer_layer(x, params, *, num_heads):
    """x: (L, N, C) float32, matching PyTorch MultiheadAttention (batch_first=False)."""
    L, N, C = x.shape
    wq, wk, wv, win, bin_, wo, bo, w1, w2 = params
    head_dim = C // num_heads
    scale = 1.0 / math.sqrt(head_dim)
    f32, bf16 = jnp.float32, jnp.bfloat16

    # Fuse the outer q/k/v Linear with MHA's in_proj (both compute x @ W.T) and fold the
    # 1/sqrt(Dh) softmax scale into the fused q weight & bias -- all at trace time.
    wq_eff = (wq.astype(f32).T @ win[:C].astype(f32).T) * scale            # (C, C)
    wk_eff = wk.astype(f32).T @ win[C:2 * C].astype(f32).T
    wv_eff = wv.astype(f32).T @ win[2 * C:].astype(f32).T
    wqkv = jnp.concatenate([wq_eff, wk_eff, wv_eff], axis=1).astype(bf16)  # (C, 3C)
    bqkv = jnp.concatenate(
        [bin_[:C] * scale, bin_[C:2 * C], bin_[2 * C:]]).reshape(1, 3 * C).astype(f32)

    wo_t = wo.astype(f32).T.astype(bf16)   # pre-transposed: kernel does x @ W
    w1_t = w1.astype(f32).T.astype(bf16)
    w2_t = w2.astype(f32).T.astype(bf16)
    bo2 = bo.reshape(1, C).astype(f32)

    nb = _pick_batch_block(N, L, C)
    grid = (N // nb,)

    # Lane-dense (L, N*C) view of the (L, N, C) activations: a free reshape (no HBM
    # transpose pass) and the BlockSpec slices batch groups along the flattened axis.
    x_flat = x.reshape(L, N * C)

    const = lambda shape: pl.BlockSpec(shape, lambda b: (0,) * len(shape))

    out_flat = pl.pallas_call(
        functools.partial(_transformer_layer_kernel, num_heads=num_heads),
        out_shape=jax.ShapeDtypeStruct((L, N * C), x.dtype),
        grid_spec=pltpu.PrefetchScalarGridSpec(
            num_scalar_prefetch=0,
            grid=grid,
            in_specs=[
                pl.BlockSpec((L, nb * C), lambda b: (0, b)),    # activations
                const((C, 3 * C)),                              # fused qkv weight
                const((1, 3 * C)),                              # fused qkv bias
                const((C, C)),                                  # out_proj.weight.T
                const((1, C)),                                  # out_proj.bias
                const((C, C)),                                  # fc1.weight.T
                const((C, C)),                                  # fc2.weight.T
            ],
            out_specs=pl.BlockSpec((L, nb * C), lambda b: (0, b)),
            scratch_shapes=[
                pltpu.VMEM((nb * L, C), jnp.float32),           # batch-major input rows
                pltpu.VMEM((nb * L, C), jnp.float32),           # attention output rows
            ],
        ),
        compiler_params=pltpu.CompilerParams(
            dimension_semantics=("parallel",),
            vmem_limit_bytes=64 * 1024 * 1024,
        ),
    )(x_flat, wqkv, bqkv, wo_t, bo2, w1_t, w2_t)

    return out_flat.reshape(L, N, C)


def _reference(x, params, *, num_heads):
    """Pure-JAX f32 reference replicating the PyTorch module's semantics."""
    wq, wk, wv, win, bin_, wo, bo, w1, w2 = params
    L, N, C = x.shape
    Dh = C // num_heads
    q = x @ wq.T
    k = x @ wk.T
    v = x @ wv.T
    q2 = q @ win[:C].T + bin_[:C]
    k2 = k @ win[C:2 * C].T + bin_[C:2 * C]
    v2 = v @ win[2 * C:].T + bin_[2 * C:]

    def heads(t):  # (L, N, C) -> (N, H, L, Dh)
        return jnp.transpose(t.reshape(L, N, num_heads, Dh), (1, 2, 0, 3))

    qh, kh, vh = heads(q2), heads(k2), heads(v2)
    s = jnp.einsum("nhld,nhmd->nhlm", qh, kh) / math.sqrt(Dh)
    p = jax.nn.softmax(s, axis=-1)
    o = jnp.einsum("nhlm,nhmd->nhld", p, vh)                 # (N, H, L, Dh)
    o = jnp.transpose(o, (2, 0, 1, 3)).reshape(L, N, C)
    attn_out = o @ wo.T + bo
    r1 = attn_out + x
    return (r1 @ w1.T) @ w2.T + r1


if __name__ == "__main__":
    L, N, C, H = 8, 2, 32, 4   # seq, batch, channels, heads

    key = jax.random.PRNGKey(0)
    ks = jax.random.split(key, 10)
    w_scale = 0.1
    params = (
        jax.random.normal(ks[0], (C, C), jnp.float32) * w_scale,       # q.weight
        jax.random.normal(ks[1], (C, C), jnp.float32) * w_scale,       # k.weight
        jax.random.normal(ks[2], (C, C), jnp.float32) * w_scale,       # v.weight
        jax.random.normal(ks[3], (3 * C, C), jnp.float32) * w_scale,   # ma.in_proj_weight
        jax.random.normal(ks[4], (3 * C,), jnp.float32) * w_scale,     # ma.in_proj_bias
        jax.random.normal(ks[5], (C, C), jnp.float32) * w_scale,       # ma.out_proj.weight
        jax.random.normal(ks[6], (C,), jnp.float32) * w_scale,         # ma.out_proj.bias
        jax.random.normal(ks[7], (C, C), jnp.float32) * w_scale,       # fc1.weight
        jax.random.normal(ks[8], (C, C), jnp.float32) * w_scale,       # fc2.weight
    )
    x = jax.random.normal(ks[9], (L, N, C), jnp.float32)

    out = transformer_layer(x, params, num_heads=H)
    out = jax.block_until_ready(out)

    ref = _reference(x, params, num_heads=H)
    assert out.shape == (L, N, C)
    max_err = float(jnp.max(jnp.abs(out - ref)))
    # bf16 MXU operands (f32 accumulation / softmax) loosen the achievable tolerance a bit.
    assert jnp.allclose(out, ref, atol=2e-2, rtol=2e-2), (
        f"mismatch vs reference, max abs err = {max_err}")

    print("KERNEL_OK")
</pallas_src>

<mosaic_0001>
module attributes {stable_mosaic.version = 11 : i64} {
  func.func @_transformer_layer_kernel(%arg0: i32, %arg1: memref<8x64xf32, #tpu.memory_space<vmem>>, %arg2: memref<32x96xbf16, #tpu.memory_space<vmem>>, %arg3: memref<1x96xf32, #tpu.memory_space<vmem>>, %arg4: memref<32x32xbf16, #tpu.memory_space<vmem>>, %arg5: memref<1x32xf32, #tpu.memory_space<vmem>>, %arg6: memref<32x32xbf16, #tpu.memory_space<vmem>>, %arg7: memref<32x32xbf16, #tpu.memory_space<vmem>>, %arg8: memref<8x64xf32, #tpu.memory_space<vmem>>, %arg9: memref<16x32xf32, #tpu.memory_space<vmem>>, %arg10: memref<16x32xf32, #tpu.memory_space<vmem>>) attributes {dimension_semantics = [#tpu.dimension_semantics<parallel>], iteration_bounds = array<i64: 1>, scalar_prefetch = 0 : i64, scratch_operands = 2 : i64, tpu.core_type = #tpu.core_type<tc>, window_params = [{transform_indices = @transform_0, window_bounds = array<i64: 8, 64>}, {pipeline_mode = #tpu.pipeline_mode<synchronous>, transform_indices = @transform_1, window_bounds = array<i64: 32, 96>}, {pipeline_mode = #tpu.pipeline_mode<synchronous>, transform_indices = @transform_2, window_bounds = array<i64: 1, 96>}, {pipeline_mode = #tpu.pipeline_mode<synchronous>, transform_indices = @transform_3, window_bounds = array<i64: 32, 32>}, {pipeline_mode = #tpu.pipeline_mode<synchronous>, transform_indices = @transform_4, window_bounds = array<i64: 1, 32>}, {pipeline_mode = #tpu.pipeline_mode<synchronous>, transform_indices = @transform_5, window_bounds = array<i64: 32, 32>}, {pipeline_mode = #tpu.pipeline_mode<synchronous>, transform_indices = @transform_6, window_bounds = array<i64: 32, 32>}, {transform_indices = @transform_7, window_bounds = array<i64: 8, 64>}]} {
    %c0 = arith.constant 0 : index
    %c0_0 = arith.constant 0 : index
    %0 = vector.load %arg1[%c0, %c0_0] : memref<8x64xf32, #tpu.memory_space<vmem>>, vector<8x32xf32>
    %c0_1 = arith.constant 0 : index
    %c0_2 = arith.constant 0 : index
    %1 = vector.load %arg9[%c0_1, %c0_2] : memref<16x32xf32, #tpu.memory_space<vmem>>, vector<8x32xf32>
    tpu.vector_store %arg9[%c0_1, %c0_2], %0 {strides = array<i32>} : memref<16x32xf32, #tpu.memory_space<vmem>>, vector<8x32xf32>,
    %c0_3 = arith.constant 0 : index
    %c32 = arith.constant 32 : index
    %2 = vector.load %arg1[%c0_3, %c32] : memref<8x64xf32, #tpu.memory_space<vmem>>, vector<8x32xf32>
    %c8 = arith.constant 8 : index
    %c0_4 = arith.constant 0 : index
    %3 = vector.load %arg9[%c8, %c0_4] : memref<16x32xf32, #tpu.memory_space<vmem>>, vector<8x32xf32>
    tpu.vector_store %arg9[%c8, %c0_4], %2 {strides = array<i32>} : memref<16x32xf32, #tpu.memory_space<vmem>>, vector<8x32xf32>,
    %c0_5 = arith.constant 0 : index
    %c0_6 = arith.constant 0 : index
    %4 = vector.load %arg9[%c0_5, %c0_6] : memref<16x32xf32, #tpu.memory_space<vmem>>, vector<16x32xf32>
    %5 = arith.truncf %4 : vector<16x32xf32> to vector<16x32xbf16>
    %c0_7 = arith.constant 0 : index
    %c0_8 = arith.constant 0 : index
    %6 = vector.load %arg2[%c0_7, %c0_8] : memref<32x96xbf16, #tpu.memory_space<vmem>>, vector<32x96xbf16>
    %cst = arith.constant dense<0.000000e+00> : vector<16x96xf32>
    %7 = tpu.matmul %5, %6, %cst {dimension_numbers = #tpu.dot_dimension_numbers<[1], [0], [0], [1], [0, 0, 1, 1], [], []>} : vector<16x32xbf16>, vector<32x96xbf16>, vector<16x96xf32> -> vector<16x96xf32>
    %c0_9 = arith.constant 0 : index
    %c0_10 = arith.constant 0 : index
    %8 = vector.load %arg3[%c0_9, %c0_10] : memref<1x96xf32, #tpu.memory_space<vmem>>, vector<1x96xf32>
    %9 = vector.broadcast %8 : vector<1x96xf32> to vector<16x96xf32>
    %10 = arith.addf %7, %9 : vector<16x96xf32>
    %11 = arith.truncf %10 : vector<16x96xf32> to vector<16x96xbf16>
    %12 = vector.extract_strided_slice %11 {offsets = [0, 0], sizes = [8, 8], strides = [1, 1]} : vector<16x96xbf16> to vector<8x8xbf16>
    %13 = vector.extract_strided_slice %11 {offsets = [0, 32], sizes = [8, 8], strides = [1, 1]} : vector<16x96xbf16> to vector<8x8xbf16>
    %14 = vector.extract_strided_slice %11 {offsets = [0, 64], sizes = [8, 8], strides = [1, 1]} : vector<16x96xbf16> to vector<8x8xbf16>
    %cst_11 = arith.constant dense<0.000000e+00> : vector<8x8xf32>
    %15 = tpu.matmul %12, %13, %cst_11 {dimension_numbers = #tpu.dot_dimension_numbers<[1], [1], [0], [0], [0, 0, 1, 0], [], []>} : vector<8x8xbf16>, vector<8x8xbf16>, vector<8x8xf32> -> vector<8x8xf32>
    %cst_12 = arith.constant dense<0xFF800000> : vector<8xf32>
    %16 = vector.multi_reduction <maximumf>, %15, %cst_12 [1] : vector<8x8xf32> to vector<8xf32>
    %17 = vector.shape_cast %16 : vector<8xf32> to vector<8x1xf32>
    %18 = vector.broadcast %17 : vector<8x1xf32> to vector<8x8xf32>
    %19 = arith.subf %15, %18 : vector<8x8xf32>
    %20 = math.exp %19 : vector<8x8xf32>
    %cst_13 = arith.constant dense<0.000000e+00> : vector<8xf32>
    %21 = vector.multi_reduction <add>, %20, %cst_13 [1] : vector<8x8xf32> to vector<8xf32>
    %22 = vector.shape_cast %21 : vector<8xf32> to vector<8x1xf32>
    %23 = tpu.reciprocal %22 {approx = true} : vector<8x1xf32> -> vector<8x1xf32>
    %24 = vector.broadcast %23 : vector<8x1xf32> to vector<8x8xf32>
    %25 = arith.mulf %20, %24 : vector<8x8xf32>
    %26 = arith.truncf %25 : vector<8x8xf32> to vector<8x8xbf16>
    %cst_14 = arith.constant dense<0.000000e+00> : vector<8x8xf32>
    %27 = tpu.matmul %26, %14, %cst_14 {dimension_numbers = #tpu.dot_dimension_numbers<[1], [0], [0], [1], [0, 0, 1, 1], [], []>} : vector<8x8xbf16>, vector<8x8xbf16>, vector<8x8xf32> -> vector<8x8xf32>
    %c0_15 = arith.constant 0 : index
    %c0_16 = arith.constant 0 : index
    %28 = vector.load %arg10[%c0_15, %c0_16] : memref<16x32xf32, #tpu.memory_space<vmem>>, vector<8x8xf32>
    tpu.vector_store %arg10[%c0_15, %c0_16], %27 {strides = array<i32>} : memref<16x32xf32, #tpu.memory_space<vmem>>, vector<8x8xf32>,
    %29 = vector.extract_strided_slice %11 {offsets = [0, 8], sizes = [8, 8], strides = [1, 1]} : vector<16x96xbf16> to vector<8x8xbf16>
    %30 = vector.extract_strided_slice %11 {offsets = [0, 40], sizes = [8, 8], strides = [1, 1]} : vector<16x96xbf16> to vector<8x8xbf16>
    %31 = vector.extract_strided_slice %11 {offsets = [0, 72], sizes = [8, 8], strides = [1, 1]} : vector<16x96xbf16> to vector<8x8xbf16>
    %cst_17 = arith.constant dense<0.000000e+00> : vector<8x8xf32>
    %32 = tpu.matmul %29, %30, %cst_17 {dimension_numbers = #tpu.dot_dimension_numbers<[1], [1], [0], [0], [0, 0, 1, 0], [], []>} : vector<8x8xbf16>, vector<8x8xbf16>, vector<8x8xf32> -> vector<8x8xf32>
    %cst_18 = arith.constant dense<0xFF800000> : vector<8xf32>
    %33 = vector.multi_reduction <maximumf>, %32, %cst_18 [1] : vector<8x8xf32> to vector<8xf32>
    %34 = vector.shape_cast %33 : vector<8xf32> to vector<8x1xf32>
    %35 = vector.broadcast %34 : vector<8x1xf32> to vector<8x8xf32>
    %36 = arith.subf %32, %35 : vector<8x8xf32>
    %37 = math.exp %36 : vector<8x8xf32>
    %cst_19 = arith.constant dense<0.000000e+00> : vector<8xf32>
    %38 = vector.multi_reduction <add>, %37, %cst_19 [1] : vector<8x8xf32> to vector<8xf32>
    %39 = vector.shape_cast %38 : vector<8xf32> to vector<8x1xf32>
    %40 = tpu.reciprocal %39 {approx = true} : vector<8x1xf32> -> vector<8x1xf32>
    %41 = vector.broadcast %40 : vector<8x1xf32> to vector<8x8xf32>
    %42 = arith.mulf %37, %41 : vector<8x8xf32>
    %43 = arith.truncf %42 : vector<8x8xf32> to vector<8x8xbf16>
    %cst_20 = arith.constant dense<0.000000e+00> : vector<8x8xf32>
    %44 = tpu.matmul %43, %31, %cst_20 {dimension_numbers = #tpu.dot_dimension_numbers<[1], [0], [0], [1], [0, 0, 1, 1], [], []>} : vector<8x8xbf16>, vector<8x8xbf16>, vector<8x8xf32> -> vector<8x8xf32>
    %c0_21 = arith.constant 0 : index
    %c8_22 = arith.constant 8 : index
    %45 = vector.load %arg10[%c0_21, %c8_22] : memref<16x32xf32, #tpu.memory_space<vmem>>, vector<8x8xf32>
    tpu.vector_store %arg10[%c0_21, %c8_22], %44 {strides = array<i32>} : memref<16x32xf32, #tpu.memory_space<vmem>>, vector<8x8xf32>,
    %46 = vector.extract_strided_slice %11 {offsets = [0, 16], sizes = [8, 8], strides = [1, 1]} : vector<16x96xbf16> to vector<8x8xbf16>
    %47 = vector.extract_strided_slice %11 {offsets = [0, 48], sizes = [8, 8], strides = [1, 1]} : vector<16x96xbf16> to vector<8x8xbf16>
    %48 = vector.extract_strided_slice %11 {offsets = [0, 80], sizes = [8, 8], strides = [1, 1]} : vector<16x96xbf16> to vector<8x8xbf16>
    %cst_23 = arith.constant dense<0.000000e+00> : vector<8x8xf32>
    %49 = tpu.matmul %46, %47, %cst_23 {dimension_numbers = #tpu.dot_dimension_numbers<[1], [1], [0], [0], [0, 0, 1, 0], [], []>} : vector<8x8xbf16>, vector<8x8xbf16>, vector<8x8xf32> -> vector<8x8xf32>
    %cst_24 = arith.constant dense<0xFF800000> : vector<8xf32>
    %50 = vector.multi_reduction <maximumf>, %49, %cst_24 [1] : vector<8x8xf32> to vector<8xf32>
    %51 = vector.shape_cast %50 : vector<8xf32> to vector<8x1xf32>
    %52 = vector.broadcast %51 : vector<8x1xf32> to vector<8x8xf32>
    %53 = arith.subf %49, %52 : vector<8x8xf32>
    %54 = math.exp %53 : vector<8x8xf32>
    %cst_25 = arith.constant dense<0.000000e+00> : vector<8xf32>
    %55 = vector.multi_reduction <add>, %54, %cst_25 [1] : vector<8x8xf32> to vector<8xf32>
    %56 = vector.shape_cast %55 : vector<8xf32> to vector<8x1xf32>
    %57 = tpu.reciprocal %56 {approx = true} : vector<8x1xf32> -> vector<8x1xf32>
    %58 = vector.broadcast %57 : vector<8x1xf32> to vector<8x8xf32>
    %59 = arith.mulf %54, %58 : vector<8x8xf32>
    %60 = arith.truncf %59 : vector<8x8xf32> to vector<8x8xbf16>
    %cst_26 = arith.constant dense<0.000000e+00> : vector<8x8xf32>
    %61 = tpu.matmul %60, %48, %cst_26 {dimension_numbers = #tpu.dot_dimension_numbers<[1], [0], [0], [1], [0, 0, 1, 1], [], []>} : vector<8x8xbf16>, vector<8x8xbf16>, vector<8x8xf32> -> vector<8x8xf32>
    %c0_27 = arith.constant 0 : index
    %c16 = arith.constant 16 : index
    %62 = vector.load %arg10[%c0_27, %c16] : memref<16x32xf32, #tpu.memory_space<vmem>>, vector<8x8xf32>
    tpu.vector_store %arg10[%c0_27, %c16], %61 {strides = array<i32>} : memref<16x32xf32, #tpu.memory_space<vmem>>, vector<8x8xf32>,
    %63 = vector.extract_strided_slice %11 {offsets = [0, 24], sizes = [8, 8], strides = [1, 1]} : vector<16x96xbf16> to vector<8x8xbf16>
    %64 = vector.extract_strided_slice %11 {offsets = [0, 56], sizes = [8, 8], strides = [1, 1]} : vector<16x96xbf16> to vector<8x8xbf16>
    %65 = vector.extract_strided_slice %11 {offsets = [0, 88], sizes = [8, 8], strides = [1, 1]} : vector<16x96xbf16> to vector<8x8xbf16>
    %cst_28 = arith.constant dense<0.000000e+00> : vector<8x8xf32>
    %66 = tpu.matmul %63, %64, %cst_28 {dimension_numbers = #tpu.dot_dimension_numbers<[1], [1], [0], [0], [0, 0, 1, 0], [], []>} : vector<8x8xbf16>, vector<8x8xbf16>, vector<8x8xf32> -> vector<8x8xf32>
    %cst_29 = arith.constant dense<0xFF800000> : vector<8xf32>
    %67 = vector.multi_reduction <maximumf>, %66, %cst_29 [1] : vector<8x8xf32> to vector<8xf32>
    %68 = vector.shape_cast %67 : vector<8xf32> to vector<8x1xf32>
    %69 = vector.broadcast %68 : vector<8x1xf32> to vector<8x8xf32>
    %70 = arith.subf %66, %69 : vector<8x8xf32>
    %71 = math.exp %70 : vector<8x8xf32>
    %cst_30 = arith.constant dense<0.000000e+00> : vector<8xf32>
    %72 = vector.multi_reduction <add>, %71, %cst_30 [1] : vector<8x8xf32> to vector<8xf32>
    %73 = vector.shape_cast %72 : vector<8xf32> to vector<8x1xf32>
    %74 = tpu.reciprocal %73 {approx = true} : vector<8x1xf32> -> vector<8x1xf32>
    %75 = vector.broadcast %74 : vector<8x1xf32> to vector<8x8xf32>
    %76 = arith.mulf %71, %75 : vector<8x8xf32>
    %77 = arith.truncf %76 : vector<8x8xf32> to vector<8x8xbf16>
    %cst_31 = arith.constant dense<0.000000e+00> : vector<8x8xf32>
    %78 = tpu.matmul %77, %65, %cst_31 {dimension_numbers = #tpu.dot_dimension_numbers<[1], [0], [0], [1], [0, 0, 1, 1], [], []>} : vector<8x8xbf16>, vector<8x8xbf16>, vector<8x8xf32> -> vector<8x8xf32>
    %c0_32 = arith.constant 0 : index
    %c24 = arith.constant 24 : index
    %79 = vector.load %arg10[%c0_32, %c24] : memref<16x32xf32, #tpu.memory_space<vmem>>, vector<8x8xf32>
    tpu.vector_store %arg10[%c0_32, %c24], %78 {strides = array<i32>} : memref<16x32xf32, #tpu.memory_space<vmem>>, vector<8x8xf32>,
    %80 = vector.extract_strided_slice %11 {offsets = [8, 0], sizes = [8, 8], strides = [1, 1]} : vector<16x96xbf16> to vector<8x8xbf16>
    %81 = vector.extract_strided_slice %11 {offsets = [8, 32], sizes = [8, 8], strides = [1, 1]} : vector<16x96xbf16> to vector<8x8xbf16>
    %82 = vector.extract_strided_slice %11 {offsets = [8, 64], sizes = [8, 8], strides = [1, 1]} : vector<16x96xbf16> to vector<8x8xbf16>
    %cst_33 = arith.constant dense<0.000000e+00> : vector<8x8xf32>
    %83 = tpu.matmul %80, %81, %cst_33 {dimension_numbers = #tpu.dot_dimension_numbers<[1], [1], [0], [0], [0, 0, 1, 0], [], []>} : vector<8x8xbf16>, vector<8x8xbf16>, vector<8x8xf32> -> vector<8x8xf32>
    %cst_34 = arith.constant dense<0xFF800000> : vector<8xf32>
    %84 = vector.multi_reduction <maximumf>, %83, %cst_34 [1] : vector<8x8xf32> to vector<8xf32>
    %85 = vector.shape_cast %84 : vector<8xf32> to vector<8x1xf32>
    %86 = vector.broadcast %85 : vector<8x1xf32> to vector<8x8xf32>
    %87 = arith.subf %83, %86 : vector<8x8xf32>
    %88 = math.exp %87 : vector<8x8xf32>
    %cst_35 = arith.constant dense<0.000000e+00> : vector<8xf32>
    %89 = vector.multi_reduction <add>, %88, %cst_35 [1] : vector<8x8xf32> to vector<8xf32>
    %90 = vector.shape_cast %89 : vector<8xf32> to vector<8x1xf32>
    %91 = tpu.reciprocal %90 {approx = true} : vector<8x1xf32> -> vector<8x1xf32>
    %92 = vector.broadcast %91 : vector<8x1xf32> to vector<8x8xf32>
    %93 = arith.mulf %88, %92 : vector<8x8xf32>
    %94 = arith.truncf %93 : vector<8x8xf32> to vector<8x8xbf16>
    %cst_36 = arith.constant dense<0.000000e+00> : vector<8x8xf32>
    %95 = tpu.matmul %94, %82, %cst_36 {dimension_numbers = #tpu.dot_dimension_numbers<[1], [0], [0], [1], [0, 0, 1, 1], [], []>} : vector<8x8xbf16>, vector<8x8xbf16>, vector<8x8xf32> -> vector<8x8xf32>
    %c8_37 = arith.constant 8 : index
    %c0_38 = arith.constant 0 : index
    %96 = vector.load %arg10[%c8_37, %c0_38] : memref<16x32xf32, #tpu.memory_space<vmem>>, vector<8x8xf32>
    tpu.vector_store %arg10[%c8_37, %c0_38], %95 {strides = array<i32>} : memref<16x32xf32, #tpu.memory_space<vmem>>, vector<8x8xf32>,
    %97 = vector.extract_strided_slice %11 {offsets = [8, 8], sizes = [8, 8], strides = [1, 1]} : vector<16x96xbf16> to vector<8x8xbf16>
    %98 = vector.extract_strided_slice %11 {offsets = [8, 40], sizes = [8, 8], strides = [1, 1]} : vector<16x96xbf16> to vector<8x8xbf16>
    %99 = vector.extract_strided_slice %11 {offsets = [8, 72], sizes = [8, 8], strides = [1, 1]} : vector<16x96xbf16> to vector<8x8xbf16>
    %cst_39 = arith.constant dense<0.000000e+00> : vector<8x8xf32>
    %100 = tpu.matmul %97, %98, %cst_39 {dimension_numbers = #tpu.dot_dimension_numbers<[1], [1], [0], [0], [0, 0, 1, 0], [], []>} : vector<8x8xbf16>, vector<8x8xbf16>, vector<8x8xf32> -> vector<8x8xf32>
    %cst_40 = arith.constant dense<0xFF800000> : vector<8xf32>
    %101 = vector.multi_reduction <maximumf>, %100, %cst_40 [1] : vector<8x8xf32> to vector<8xf32>
    %102 = vector.shape_cast %101 : vector<8xf32> to vector<8x1xf32>
    %103 = vector.broadcast %102 : vector<8x1xf32> to vector<8x8xf32>
    %104 = arith.subf %100, %103 : vector<8x8xf32>
    %105 = math.exp %104 : vector<8x8xf32>
    %cst_41 = arith.constant dense<0.000000e+00> : vector<8xf32>
    %106 = vector.multi_reduction <add>, %105, %cst_41 [1] : vector<8x8xf32> to vector<8xf32>
    %107 = vector.shape_cast %106 : vector<8xf32> to vector<8x1xf32>
    %108 = tpu.reciprocal %107 {approx = true} : vector<8x1xf32> -> vector<8x1xf32>
    %109 = vector.broadcast %108 : vector<8x1xf32> to vector<8x8xf32>
    %110 = arith.mulf %105, %109 : vector<8x8xf32>
    %111 = arith.truncf %110 : vector<8x8xf32> to vector<8x8xbf16>
    %cst_42 = arith.constant dense<0.000000e+00> : vector<8x8xf32>
    %112 = tpu.matmul %111, %99, %cst_42 {dimension_numbers = #tpu.dot_dimension_numbers<[1], [0], [0], [1], [0, 0, 1, 1], [], []>} : vector<8x8xbf16>, vector<8x8xbf16>, vector<8x8xf32> -> vector<8x8xf32>
    %c8_43 = arith.constant 8 : index
    %c8_44 = arith.constant 8 : index
    %113 = vector.load %arg10[%c8_43, %c8_44] : memref<16x32xf32, #tpu.memory_space<vmem>>, vector<8x8xf32>
    tpu.vector_store %arg10[%c8_43, %c8_44], %112 {strides = array<i32>} : memref<16x32xf32, #tpu.memory_space<vmem>>, vector<8x8xf32>,
    %114 = vector.extract_strided_slice %11 {offsets = [8, 16], sizes = [8, 8], strides = [1, 1]} : vector<16x96xbf16> to vector<8x8xbf16>
    %115 = vector.extract_strided_slice %11 {offsets = [8, 48], sizes = [8, 8], strides = [1, 1]} : vector<16x96xbf16> to vector<8x8xbf16>
    %116 = vector.extract_strided_slice %11 {offsets = [8, 80], sizes = [8, 8], strides = [1, 1]} : vector<16x96xbf16> to vector<8x8xbf16>
    %cst_45 = arith.constant dense<0.000000e+00> : vector<8x8xf32>
    %117 = tpu.matmul %114, %115, %cst_45 {dimension_numbers = #tpu.dot_dimension_numbers<[1], [1], [0], [0], [0, 0, 1, 0], [], []>} : vector<8x8xbf16>, vector<8x8xbf16>, vector<8x8xf32> -> vector<8x8xf32>
    %cst_46 = arith.constant dense<0xFF800000> : vector<8xf32>
    %118 = vector.multi_reduction <maximumf>, %117, %cst_46 [1] : vector<8x8xf32> to vector<8xf32>
    %119 = vector.shape_cast %118 : vector<8xf32> to vector<8x1xf32>
    %120 = vector.broadcast %119 : vector<8x1xf32> to vector<8x8xf32>
    %121 = arith.subf %117, %120 : vector<8x8xf32>
    %122 = math.exp %121 : vector<8x8xf32>
    %cst_47 = arith.constant dense<0.000000e+00> : vector<8xf32>
    %123 = vector.multi_reduction <add>, %122, %cst_47 [1] : vector<8x8xf32> to vector<8xf32>
    %124 = vector.shape_cast %123 : vector<8xf32> to vector<8x1xf32>
    %125 = tpu.reciprocal %124 {approx = true} : vector<8x1xf32> -> vector<8x1xf32>
    %126 = vector.broadcast %125 : vector<8x1xf32> to vector<8x8xf32>
    %127 = arith.mulf %122, %126 : vector<8x8xf32>
    %128 = arith.truncf %127 : vector<8x8xf32> to vector<8x8xbf16>
    %cst_48 = arith.constant dense<0.000000e+00> : vector<8x8xf32>
    %129 = tpu.matmul %128, %116, %cst_48 {dimension_numbers = #tpu.dot_dimension_numbers<[1], [0], [0], [1], [0, 0, 1, 1], [], []>} : vector<8x8xbf16>, vector<8x8xbf16>, vector<8x8xf32> -> vector<8x8xf32>
    %c8_49 = arith.constant 8 : index
    %c16_50 = arith.constant 16 : index
    %130 = vector.load %arg10[%c8_49, %c16_50] : memref<16x32xf32, #tpu.memory_space<vmem>>, vector<8x8xf32>
    tpu.vector_store %arg10[%c8_49, %c16_50], %129 {strides = array<i32>} : memref<16x32xf32, #tpu.memory_space<vmem>>, vector<8x8xf32>,
    %131 = vector.extract_strided_slice %11 {offsets = [8, 24], sizes = [8, 8], strides = [1, 1]} : vector<16x96xbf16> to vector<8x8xbf16>
    %132 = vector.extract_strided_slice %11 {offsets = [8, 56], sizes = [8, 8], strides = [1, 1]} : vector<16x96xbf16> to vector<8x8xbf16>
    %133 = vector.extract_strided_slice %11 {offsets = [8, 88], sizes = [8, 8], strides = [1, 1]} : vector<16x96xbf16> to vector<8x8xbf16>
    %cst_51 = arith.constant dense<0.000000e+00> : vector<8x8xf32>
    %134 = tpu.matmul %131, %132, %cst_51 {dimension_numbers = #tpu.dot_dimension_numbers<[1], [1], [0], [0], [0, 0, 1, 0], [], []>} : vector<8x8xbf16>, vector<8x8xbf16>, vector<8x8xf32> -> vector<8x8xf32>
    %cst_52 = arith.constant dense<0xFF800000> : vector<8xf32>
    %135 = vector.multi_reduction <maximumf>, %134, %cst_52 [1] : vector<8x8xf32> to vector<8xf32>
    %136 = vector.shape_cast %135 : vector<8xf32> to vector<8x1xf32>
    %137 = vector.broadcast %136 : vector<8x1xf32> to vector<8x8xf32>
    %138 = arith.subf %134, %137 : vector<8x8xf32>
    %139 = math.exp %138 : vector<8x8xf32>
    %cst_53 = arith.constant dense<0.000000e+00> : vector<8xf32>
    %140 = vector.multi_reduction <add>, %139, %cst_53 [1] : vector<8x8xf32> to vector<8xf32>
    %141 = vector.shape_cast %140 : vector<8xf32> to vector<8x1xf32>
    %142 = tpu.reciprocal %141 {approx = true} : vector<8x1xf32> -> vector<8x1xf32>
    %143 = vector.broadcast %142 : vector<8x1xf32> to vector<8x8xf32>
    %144 = arith.mulf %139, %143 : vector<8x8xf32>
    %145 = arith.truncf %144 : vector<8x8xf32> to vector<8x8xbf16>
    %cst_54 = arith.constant dense<0.000000e+00> : vector<8x8xf32>
    %146 = tpu.matmul %145, %133, %cst_54 {dimension_numbers = #tpu.dot_dimension_numbers<[1], [0], [0], [1], [0, 0, 1, 1], [], []>} : vector<8x8xbf16>, vector<8x8xbf16>, vector<8x8xf32> -> vector<8x8xf32>
    %c8_55 = arith.constant 8 : index
    %c24_56 = arith.constant 24 : index
    %147 = vector.load %arg10[%c8_55, %c24_56] : memref<16x32xf32, #tpu.memory_space<vmem>>, vector<8x8xf32>
    tpu.vector_store %arg10[%c8_55, %c24_56], %146 {strides = array<i32>} : memref<16x32xf32, #tpu.memory_space<vmem>>, vector<8x8xf32>,
    %c0_57 = arith.constant 0 : index
    %c0_58 = arith.constant 0 : index
    %148 = vector.load %arg10[%c0_57, %c0_58] : memref<16x32xf32, #tpu.memory_space<vmem>>, vector<16x32xf32>
    %149 = arith.truncf %148 : vector<16x32xf32> to vector<16x32xbf16>
    %c0_59 = arith.constant 0 : index
    %c0_60 = arith.constant 0 : index
    %150 = vector.load %arg4[%c0_59, %c0_60] : memref<32x32xbf16, #tpu.memory_space<vmem>>, vector<32x32xbf16>
    %cst_61 = arith.constant dense<0.000000e+00> : vector<16x32xf32>
    %151 = tpu.matmul %149, %150, %cst_61 {dimension_numbers = #tpu.dot_dimension_numbers<[1], [0], [0], [1], [0, 0, 1, 1], [], []>} : vector<16x32xbf16>, vector<32x32xbf16>, vector<16x32xf32> -> vector<16x32xf32>
    %c0_62 = arith.constant 0 : index
    %c0_63 = arith.constant 0 : index
    %152 = vector.load %arg5[%c0_62, %c0_63] : memref<1x32xf32, #tpu.memory_space<vmem>>, vector<1x32xf32>
    %153 = vector.broadcast %152 : vector<1x32xf32> to vector<16x32xf32>
    %154 = arith.addf %151, %153 : vector<16x32xf32>
    %c0_64 = arith.constant 0 : index
    %c0_65 = arith.constant 0 : index
    %155 = vector.load %arg9[%c0_64, %c0_65] : memref<16x32xf32, #tpu.memory_space<vmem>>, vector<16x32xf32>
    %156 = arith.addf %154, %155 : vector<16x32xf32>
    %157 = arith.truncf %156 : vector<16x32xf32> to vector<16x32xbf16>
    %c0_66 = arith.constant 0 : index
    %c0_67 = arith.constant 0 : index
    %158 = vector.load %arg6[%c0_66, %c0_67] : memref<32x32xbf16, #tpu.memory_space<vmem>>, vector<32x32xbf16>
    %cst_68 = arith.constant dense<0.000000e+00> : vector<16x32xf32>
    %159 = tpu.matmul %157, %158, %cst_68 {dimension_numbers = #tpu.dot_dimension_numbers<[1], [0], [0], [1], [0, 0, 1, 1], [], []>} : vector<16x32xbf16>, vector<32x32xbf16>, vector<16x32xf32> -> vector<16x32xf32>
    %160 = arith.truncf %159 : vector<16x32xf32> to vector<16x32xbf16>
    %c0_69 = arith.constant 0 : index
    %c0_70 = arith.constant 0 : index
    %161 = vector.load %arg7[%c0_69, %c0_70] : memref<32x32xbf16, #tpu.memory_space<vmem>>, vector<32x32xbf16>
    %cst_71 = arith.constant dense<0.000000e+00> : vector<16x32xf32>
    %162 = tpu.matmul %160, %161, %cst_71 {dimension_numbers = #tpu.dot_dimension_numbers<[1], [0], [0], [1], [0, 0, 1, 1], [], []>} : vector<16x32xbf16>, vector<32x32xbf16>, vector<16x32xf32> -> vector<16x32xf32>
    %163 = arith.addf %162, %156 : vector<16x32xf32>
    %164 = vector.extract_strided_slice %163 {offsets = [0, 0], sizes = [8, 32], strides = [1, 1]} : vector<16x32xf32> to vector<8x32xf32>
    %c0_72 = arith.constant 0 : index
    %c0_73 = arith.constant 0 : index
    %165 = vector.load %arg8[%c0_72, %c0_73] : memref<8x64xf32, #tpu.memory_space<vmem>>, vector<8x32xf32>
    tpu.vector_store %arg8[%c0_72, %c0_73], %164 {strides = array<i32>} : memref<8x64xf32, #tpu.memory_space<vmem>>, vector<8x32xf32>,
    %166 = vector.extract_strided_slice %163 {offsets = [8, 0], sizes = [8, 32], strides = [1, 1]} : vector<16x32xf32> to vector<8x32xf32>
    %c0_74 = arith.constant 0 : index
    %c32_75 = arith.constant 32 : index
    %167 = vector.load %arg8[%c0_74, %c32_75] : memref<8x64xf32, #tpu.memory_space<vmem>>, vector<8x32xf32>
    tpu.vector_store %arg8[%c0_74, %c32_75], %166 {strides = array<i32>} : memref<8x64xf32, #tpu.memory_space<vmem>>, vector<8x32xf32>,
    return
  }
  func.func @transform_0(%arg0: i32) -> (i32, i32) {
    %c0_i32 = arith.constant 0 : i32
    %c0_i32_0 = arith.constant 0 : i32
    return %c0_i32, %arg0 : i32, i32
  }
  func.func @transform_1(%arg0: i32) -> (i32, i32) {
    %c0_i32 = arith.constant 0 : i32
    %c0_i32_0 = arith.constant 0 : i32
    %c0_i32_1 = arith.constant 0 : i32
    return %c0_i32, %c0_i32_0 : i32, i32
  }
  func.func @transform_2(%arg0: i32) -> (i32, i32) {
    %c0_i32 = arith.constant 0 : i32
    %c0_i32_0 = arith.constant 0 : i32
    %c0_i32_1 = arith.constant 0 : i32
    return %c0_i32, %c0_i32_0 : i32, i32
  }
  func.func @transform_3(%arg0: i32) -> (i32, i32) {
    %c0_i32 = arith.constant 0 : i32
    %c0_i32_0 = arith.constant 0 : i32
    %c0_i32_1 = arith.constant 0 : i32
    return %c0_i32, %c0_i32_0 : i32, i32
  }
  func.func @transform_4(%arg0: i32) -> (i32, i32) {
    %c0_i32 = arith.constant 0 : i32
    %c0_i32_0 = arith.constant 0 : i32
    %c0_i32_1 = arith.constant 0 : i32
    return %c0_i32, %c0_i32_0 : i32, i32
  }
  func.func @transform_5(%arg0: i32) -> (i32, i32) {
    %c0_i32 = arith.constant 0 : i32
    %c0_i32_0 = arith.constant 0 : i32
    %c0_i32_1 = arith.constant 0 : i32
    return %c0_i32, %c0_i32_0 : i32, i32
  }
  func.func @transform_6(%arg0: i32) -> (i32, i32) {
    %c0_i32 = arith.constant 0 : i32
    %c0_i32_0 = arith.constant 0 : i32
    %c0_i32_1 = arith.constant 0 : i32
    return %c0_i32, %c0_i32_0 : i32, i32
  }
  func.func @transform_7(%arg0: i32) -> (i32, i32) {
    %c0_i32 = arith.constant 0 : i32
    %c0_i32_0 = arith.constant 0 : i32
    return %c0_i32, %arg0 : i32, i32
  }
}

</mosaic_0001>

<bundles_post_ra>
// kernel: tpu_custom_call.1
= control target key start
LH: loop header
LB: loop body
LE: loop exit
PB: predicated region body
PF: predicated region fallthrough
CT: control target
= control target key end

     0   :  { %12 = vsyncpa [#allocation5], 0  ;;  %s1268_s0 = inlined_call_operand.hbm [shape: f32[8,64], index: 0, kind: input, shape index: {}]   ;;  %s1269_s1 = inlined_call_operand.hbm [shape: bf16[32,96], index: 1, kind: input, shape index: {}]   ;;  %s1270_s2 = inlined_call_operand.vmem [shape: f32[1,96], index: 2, kind: input, shape index: {}]   ;;  %s1271_s3 = inlined_call_operand.hbm [shape: bf16[32,32], index: 3, kind: input, shape index: {}]   ;;  %s1272_s4 = inlined_call_operand.vmem [shape: f32[1,32], index: 4, kind: input, shape index: {}]   ;;  %s1273_s5 = inlined_call_operand.hbm [shape: bf16[32,32], index: 5, kind: input, shape index: {}]   ;;  %s1274_s6 = inlined_call_operand.hbm [shape: bf16[32,32], index: 6, kind: input, shape index: {}]   ;;  %s1275_s7 = inlined_call_operand.hbm [shape: f32[8,64], index: 7, kind: output, shape index: {}]  }
   0x1   :  { %13 = vsyncpa [#allocation8], 0 }
   0x2   :  { %14 = vsyncpa [#allocation11], 0  ;;  %s31_s26 = sshll.u32 %s1269_s1, 4  ;;  %s32_s26 = int_to_ptr.hbm [resolvable:$true] %s31_s26 }
   0x3   :  { %15 = vsyncpa [#allocation6], 0  ;;  %s1048_s27 = smov [#allocation7]   ;;  %s61_s8 = sshll.u32 %s1273_s5, 4  ;;  %s62_s8 = int_to_ptr.hbm [resolvable:$true] %s61_s8 }
   0x4   :  { %s33_s28 = sshll.u32 %s1048_s27, 4  ;;  %s1049_s9 = smov 64   ;;  %s34_s28 = int_to_ptr.vmem [resolvable:$true] %s33_s28 }
   0x5   :  { %s1050_s10 = smov 4   ;;  %s1051_s11 = smov [#allocation10]  }
   0x6   :  { %39 = dma.hbm_to_vmem [thread:$0]  %s32_s26, 256, %s34_s28, [#allocation8], %s1049_s9, %s1049_s9, %s1050_s10  }
   0x7   :  { %s63_s12 = sshll.u32 %s1051_s11, 4  ;;  %s21_s1 = sshll.u32 %s1268_s0, 4  ;;  %s64_s12 = int_to_ptr.vmem [resolvable:$true] %s63_s12  ;;  %s22_s1 = int_to_ptr.hbm [resolvable:$true] %s21_s1 }
   0x8   :  { %69 = dma.hbm_to_vmem [thread:$0]  %s62_s8, 256, %s64_s12, [#allocation11], %s1049_s9, %s1049_s9, %s1050_s10  }
   0x9   :  { %s46_s5 = sshll.u32 %s1271_s3, 4  ;;  %s1052_s17 = smov [#allocation4]   ;;  %s47_s5 = int_to_ptr.hbm [resolvable:$true] %s46_s5 }
   0xa   :  { %s23_s18 = sshll.u32 %s1052_s17, 4  ;;  %s1053_s19 = smov [#allocation9]   ;;  %s24_s18 = int_to_ptr.vmem [resolvable:$true] %s23_s18 }
   0xb   :  { %26 = dma.hbm_to_vmem [thread:$0]  %s22_s1, 128, %s24_s18, [#allocation5]  }
   0xc   :  { %s48_s20 = sshll.u32 %s1053_s19, 4  ;;  %s74_s0 = sshll.u32 %s1274_s6, 4  ;;  %s49_s20 = int_to_ptr.vmem [resolvable:$true] %s48_s20  ;;  %s75_s0 = int_to_ptr.hbm [resolvable:$true] %s74_s0 }
   0xd   :  { %54 = dma.hbm_to_vmem [thread:$0]  %s47_s5, 256, %s49_s20, [#allocation8], %s1049_s9, %s1049_s9, %s1050_s10  }
   0xe   :  { %s1054_s23 = smov [#allocation12]  }
   0xf   :  { %s76_s24 = sshll.u32 %s1054_s23, 4  ;;  %s77_s24 = int_to_ptr.vmem [resolvable:$true] %s76_s24 }
  0x10   :  { %82 = dma.hbm_to_vmem [thread:$0]  %s75_s0, 256, %s77_s24, [#allocation11], %s1049_s9, %s1049_s9, %s1050_s10  }
  0x11   :  { %1040 = dma.done.wait [#allocation5], 128  }
  0x12   :  { %1041 = vsyncadd [#allocation5], 4294967168 }
  0x13   :  { %1042 = dma.done.wait [#allocation8], 512  }
  0x14   :  { %1043 = vsyncadd [#allocation8], 4294966784 }
  0x15   :  { %1044 = dma.done.wait [#allocation11], 512  }
  0x16   :  { %1045 = vsyncadd [#allocation11], 4294966784  ;;  %vm105_vm0 = vcmask 261120   ;;  %v107_v0 = vld [vmem:[#allocation4] sm:$0xff]  ;;  %s1055_s3 = smov 96   ;;  %v833_v1 = vld [vmem:[#allocation7 + $0x8] sm:$0xff] }
  0x17   :  { %109 = vrot.lane.b32.xlu0 %v107_v0, %s1055_s3  ;;  %106 = vst.msk [vmem:[#allocation2] sm:$0xff] %vm105_vm0, %v107_v0  ;;  %145 = vmatpush.bf16.msra.mxu0 %v833_v1  ;;  %v832_v2 = vld [vmem:[#allocation7] sm:$0xff]  ;;  %v862_v7 = vld [vmem:[%s1270_s2] ss:$0 sm:$0xff]  ;;  %s1056_s26 = smov 72   ;;  %s1057_s27 = smov 88  }
  0x18   :  { %s1058_s28 = smov 104   ;;  %s1059_s2 = smov 120   ;;  %vm160_vm1 = vcmask 64512   ;;  %vm197_vm2 = vcmask 1043456   ;;  %vm275_vm3 = vcmask 130112   ;;  %vm337_vm4 = vcmask 195712  }
  0x19   :  { %s1060_s29 = smov 80   ;;  %s1061_s30 = smov 112   ;;  %vm399_vm5 = vcmask 261312   ;;  %vm759_vm6 = vcmask 523520  }
  0x1a   :  { %s1062_s8 = smov 56   ;;  %s1063_s10 = smov 40  }
  0x1b   :  { %146 = vmatpush.bf16.msra.mxu0 %v832_v2  ;;  %s1064_s11 = smov 48   ;;  %s1066_s12 = smov 8  }
  0x1c   :  { %s1067_s13 = smov 24   ;;  %s1069_s15 = smov [#allocation13]  }
  0x1d   :  { %s766_s16 = sshll.u32 %s1069_s15, 4  ;;  %s768_s18 = sshll.u32 %s1275_s7, 4  ;;  %s767_s16 = int_to_ptr.vmem [resolvable:$true] %s766_s16  ;;  %s769_s18 = int_to_ptr.hbm [resolvable:$true] %s768_s18 }
  0x1e   :  { %v1136_v4 = vld [vmem:[#allocation2] sm:$0xff] }
  0x89   :  { %v110_v3 = vpop.permute.xlu0 %109 }
  0x8a   :  { %112 = vst.msk [vmem:[#allocation2 + $0x8] sm:$0xff] %vm105_vm0, %v110_v3 }
  0x91   :  { %v1138_v5 = vld [vmem:[#allocation2 + $0x8] sm:$0xff] }
  0x92   :  { %v115_v6 = vpack.c.bf16 %v1138_v5, %v1136_v4 }
  0x94   :  { %788 = vmatmul.msk.bf16.vlgmr.msra.gmra.mxu0 %vm105_vm0, %v115_v6 }
 0x111   :  { %v148_v8 = vpop.f32.mrf.mxu0 }
 0x112   :  { %v149_v9 = vadd.f32 %v862_v7, %v148_v8 }
 0x114   :  { %v153_v10 = vpack.c.bf16 %v149_v9, %v149_v9 }
 0x116   :  { %v156_v11 = vunpack.c.l.b16 %v153_v10 }
 0x118   :  { %v1146_v12 = vpack.c.b16 %v156_v11, %v156_v11 }
 0x119   :  { %v150_v13 = vpop.f32.mrf.mxu0 }
 0x11a   :  { %341 = vrot.lane.b32.xlu2 %v1146_v12, %s1056_s26  ;;  %217 = vrot.lane.b32.xlu1 %v1146_v12, %s1057_s27  ;;  %v151_v14 = vadd.f32 %v862_v7, %v150_v13 }
 0x11b   :  { %158 = vrot.lane.b32.xlu0 %v1146_v12, %s1055_s3 }
 0x11c   :  { %v154_v15 = vpack.c.bf16 %v151_v14, %v151_v14 }
 0x11e   :  { %v402_v16 = vunpack.c.l.b16 %v154_v15 }
 0x120   :  { %v1155_v17 = vpack.c.b16 %v402_v16, %v402_v16 }
 0x122   :  { %339 = vrot.lane.b32.xlu2 %v1146_v12, %s1058_s28  ;;  %215 = vrot.lane.b32.xlu1 %v1146_v12, %s1059_s2 }
 0x123   :  { %279 = vrot.lane.b32.xlu0 %v1146_v12, %s1060_s29 }
 0x12a   :  { %277 = vrot.lane.b32.xlu2 %v1146_v12, %s1061_s30  ;;  %461 = vrot.lane.b32.xlu1 %v1155_v17, %s1057_s27 }
 0x12b   :  { %459 = vrot.lane.b32.xlu0 %v1155_v17, %s1059_s2 }
 0x132   :  { %583 = vrot.lane.b32.xlu2 %v1155_v17, %s1056_s26  ;;  %404 = vrot.lane.b32.xlu1 %v1155_v17, %s1055_s3 }
 0x133   :  { %581 = vrot.lane.b32.xlu0 %v1155_v17, %s1058_s28 }
 0x13a   :  { %520 = vrot.lane.b32.xlu2 %v1155_v17, %s1061_s30  ;;  %522 = vrot.lane.b32.xlu1 %v1155_v17, %s1060_s29 }
 0x142   :  { %250 = vrot.lane.b32.xlu2 %v1146_v12, %s1062_s8 }
 0x174   :  { %v342_v18 = vpop.permute.xlu2 %341 }
 0x175   :  { %v347_v24 = vsel %vm160_vm1, %v342_v18, 0 }
 0x17c   :  { %v340_v22 = vpop.permute.xlu2 %339 }
 0x184   :  { %v278_v28 = vpop.permute.xlu2 %277 }
 0x18c   :  { %v218_v19 = vpop.permute.xlu1 %217  ;;  %v584_v31 = vpop.permute.xlu2 %583 }
 0x18d   :  { %v159_v20 = vpop.permute.xlu0 %158  ;;  %v223_v21 = vsel %vm160_vm1, %v218_v19, 0  ;;  %v589_v33 = vsel %vm160_vm1, %v584_v31, 0 }
 0x18e   :  { %v165_v23 = vsel %vm160_vm1, %v159_v20, 0  ;;  %232 = vmatpush.bf16.xpose.msra.mxu3 %v223_v21 }
 0x18f   :  { %174 = vmatpush.bf16.xpose.msra.mxu1 %v165_v23 }
 0x194   :  { %v216_v25 = vpop.permute.xlu1 %215  ;;  %v521_v38 = vpop.permute.xlu2 %520 }
 0x195   :  { %v280_v26 = vpop.permute.xlu0 %279  ;;  %791 = vmatmul.msk.bf16.vlgmr.msra.gmra.mxu3 %vm160_vm1, %v216_v25 }
 0x196   :  { %356 = vmatpush.bf16.xpose.msrb.mxu3 %v347_v24  ;;  %789 = vmatmul.msk.bf16.vlgmr.msra.gmra.mxu1 %vm160_vm1, %v153_v10  ;;  %v285_v27 = vsel %vm160_vm1, %v280_v26, 0 }
 0x197   :  { %294 = vmatpush.bf16.xpose.msrb.mxu0 %v285_v27 }
 0x19c   :  { %v462_v29 = vpop.permute.xlu1 %461  ;;  %v251_v0 = vpop.permute.xlu2 %250 }
 0x19d   :  { %v467_v30 = vsel %vm160_vm1, %v462_v29, 0  ;;  %v460_v37 = vpop.permute.xlu0 %459 }
 0x19e   :  { %793 = vmatmul.msk.bf16.vlgmr.msrb.gmra.mxu0 %vm160_vm1, %v278_v28  ;;  %476 = vmatpush.bf16.xpose.msra.mxu3 %v467_v30 }
 0x1a4   :  { %v405_v32 = vpop.permute.xlu1 %404 }
 0x1a5   :  { %v410_v34 = vsel %vm160_vm1, %v405_v32, 0  ;;  %795 = vmatmul.msk.bf16.vlgmr.msrb.gmra.mxu3 %vm160_vm1, %v340_v22  ;;  %v582_v39 = vpop.permute.xlu0 %581  ;;  %v256_v22 = vsel %vm197_vm2, %v251_v0, 0 }
 0x1a6   :  { %598 = vmatpush.bf16.xpose.msrb.mxu3 %v589_v33  ;;  %419 = vmatpush.bf16.xpose.msra.mxu0 %v410_v34 }
 0x1ac   :  { %v523_v35 = vpop.permute.xlu1 %522 }
 0x1ad   :  { %v528_v36 = vsel %vm160_vm1, %v523_v35, 0 }
 0x1ae   :  { %797 = vmatmul.msk.bf16.vlgmr.msra.gmra.mxu0 %vm160_vm1, %v154_v15 }
 0x1af   :  { %537 = vmatpush.bf16.xpose.msrb.mxu0 %v528_v36 }
 0x1b5   :  { %799 = vmatmul.msk.bf16.vlgmr.msra.gmra.mxu3 %vm160_vm1, %v460_v37 }
 0x1be   :  { %801 = vmatmul.msk.bf16.vlgmr.msrb.gmra.mxu0 %vm160_vm1, %v521_v38 }
 0x1c5   :  { %803 = vmatmul.msk.bf16.vlgmr.msrb.gmra.mxu3 %vm160_vm1, %v582_v39 }
 0x213   :  { %v176_v40 = vpop.f32.mrf.mxu1 }
 0x214   :  { %v180_v41 = vsel %vm160_vm1, %v176_v40, -inf }
 0x215   :  { %181 = vmax.xlane.f32.xlu0 %v180_v41 }
 0x218   :  { %v234_v42 = vpop.f32.mrf.mxu3 }
 0x219   :  { %v238_v43 = vsel %vm160_vm1, %v234_v42, -inf }
 0x21a   :  { %239 = vmax.xlane.f32.xlu1 %v238_v43 }
 0x21b   :  { %v178_v44 = vpop.f32.mrf.mxu1  ;;  %v296_v45 = vpop.f32.mrf.mxu0 }
 0x21c   :  { %v300_v46 = vsel %vm160_vm1, %v296_v45, -inf }
 0x21d   :  { %301 = vmax.xlane.f32.xlu2 %v300_v46 }
 0x220   :  { %v236_v47 = vpop.f32.mrf.mxu3 }
 0x223   :  { %v298_v48 = vpop.f32.mrf.mxu0 }
 0x228   :  { %v1187_v49 = vpop.f32.mrf.mxu3 }
 0x229   :  { %192 = vrot.lane.b32.xlu0 %v1146_v12, %s1049_s9  ;;  %v362_v54 = vsel %vm160_vm1, %v1187_v49, -inf }
 0x22b   :  { %v421_v50 = vpop.f32.mrf.mxu0 }
 0x22c   :  { %v425_v51 = vsel %vm160_vm1, %v421_v50, -inf }
 0x22d   :  { %426 = vmax.xlane.f32.xlu2 %v425_v51 }
 0x230   :  { %v360_v52 = vpop.f32.mrf.mxu3 }
 0x233   :  { %v423_v53 = vpop.f32.mrf.mxu0 }
 0x235   :  { %363 = vmax.xlane.f32.xlu2 %v362_v54 }
 0x238   :  { %v478_v55 = vpop.f32.mrf.mxu3 }
 0x239   :  { %v482_v63 = vsel %vm160_vm1, %v478_v55, -inf }
 0x23b   :  { %v539_v56 = vpop.f32.mrf.mxu0 }
 0x23c   :  { %v543_v57 = vsel %vm160_vm1, %v539_v56, -inf }
 0x23d   :  { %544 = vmax.xlane.f32.xlu1 %v543_v57 }
 0x240   :  { %v480_v58 = vpop.f32.mrf.mxu3 }
 0x243   :  { %v541_v59 = vpop.f32.mrf.mxu0 }
 0x248   :  { %v600_v60 = vpop.f32.mrf.mxu3 }
 0x249   :  { %v604_v61 = vsel %vm160_vm1, %v600_v60, -inf }
 0x24a   :  { %605 = vmax.xlane.f32.xlu1 %v604_v61 }
 0x250   :  { %v602_v62 = vpop.f32.mrf.mxu3 }
 0x253   :  { %483 = vmax.xlane.f32.xlu0 %v482_v63 }
 0x288   :  { %v182_v1 = vpop.xlane.xlu0 %181 }
 0x289   :  { %v183_v2 = vsub.f32 %v176_v40, %v182_v1 }
 0x28b   :  { %v184_v3 = vmul.f32 1.442695, %v183_v2 }
 0x28d   :  { %864 = vpow2.f32 %v184_v3  ;;  %v240_v6 = vpop.xlane.xlu1 %239 }
 0x28e   :  { %v241_v7 = vsub.f32 %v234_v42, %v240_v6 }
 0x290   :  { %v242_v8 = vmul.f32 1.442695, %v241_v7  ;;  %v302_v9 = vpop.xlane.xlu2 %301 }
 0x291   :  { %v303_v10 = vsub.f32 %v296_v45, %v302_v9 }
 0x292   :  { %866 = vpow2.f32 %v242_v8 }
 0x293   :  { %v1197_v11 = vpop.eup %864  ;;  %v304_v13 = vmul.f32 1.442695, %v303_v10 }
 0x294   :  { %v186_v14 = vsel %vm160_vm1, %v1197_v11, 0.0 }
 0x295   :  { %868 = vpow2.f32 %v304_v13  ;;  %187 = vadd.xlane.f32.xlu1 %v186_v14 }
 0x298   :  { %v1201_v15 = vpop.eup %866 }
 0x299   :  { %v244_v16 = vsel %vm160_vm1, %v1201_v15, 0.0 }
 0x29a   :  { %245 = vadd.xlane.f32.xlu2 %v244_v16 }
 0x29b   :  { %v1205_v18 = vpop.eup %868  ;;  %v193_v19 = vpop.permute.xlu0 %192 }
 0x29c   :  { %v306_v20 = vsel %vm160_vm1, %v1205_v18, 0.0  ;;  %v199_v21 = vsel %vm197_vm2, %v193_v19, 0 }
 0x29d   :  { %307 = vadd.xlane.f32.xlu0 %v306_v20  ;;  %208 = vmatpush.bf16.msra.mxu2 %v199_v21 }
 0x2a0   :  { %v427_v23 = vpop.xlane.xlu2 %426 }
 0x2a1   :  { %265 = vmatpush.bf16.msrb.mxu2 %v256_v22  ;;  %v428_v24 = vsub.f32 %v421_v50, %v427_v23 }
 0x2a3   :  { %v429_v28 = vmul.f32 1.442695, %v428_v24 }
 0x2a5   :  { %870 = vpow2.f32 %v429_v28 }
 0x2a8   :  { %v364_v29 = vpop.xlane.xlu2 %363 }
 0x2a9   :  { %v365_v31 = vsub.f32 %v1187_v49, %v364_v29 }
 0x2ab   :  { %v366_v35 = vmul.f32 1.442695, %v365_v31 }
 0x2ae   :  { %374 = vrot.lane.b32.xlu1 %v1146_v12, %s1063_s10 }
 0x2b0   :  { %v545_v25 = vpop.xlane.xlu1 %544 }
 0x2b1   :  { %494 = vrot.lane.b32.xlu0 %v1155_v17, %s1062_s8  ;;  %v546_v33 = vsub.f32 %v539_v56, %v545_v25 }
 0x2b2   :  { %312 = vrot.lane.b32.xlu2 %v1146_v12, %s1064_s11  ;;  %v871_v12 = vpop.eup %870 }
 0x2b3   :  { %v547_v36 = vmul.f32 1.442695, %v546_v33  ;;  %v431_v39 = vsel %vm160_vm1, %v871_v12, 0.0 }
 0x2b9   :  { %437 = vrot.lane.b32.xlu0 %v1155_v17, %s1049_s9  ;;  %s1065_s9 = smov 16  }
 0x2bd   :  { %v606_v32 = vpop.xlane.xlu1 %605 }
 0x2be   :  { %v607_v34 = vsub.f32 %v600_v60, %v606_v32 }
 0x2c0   :  { %v608_v37 = vmul.f32 1.442695, %v607_v34 }
 0x2c6   :  { %v484_v26 = vpop.xlane.xlu0 %483 }
 0x2c7   :  { %v485_v27 = vsub.f32 %v478_v55, %v484_v26 }
 0x2c9   :  { %v486_v30 = vmul.f32 1.442695, %v485_v27 }
 0x2cb   :  { %872 = vpow2.f32 %v486_v30 }
 0x2cc   :  { %874 = vpow2.f32 %v366_v35 }
 0x2cd   :  { %876 = vpow2.f32 %v547_v36 }
 0x2ce   :  { %878 = vpow2.f32 %v608_v37 }
 0x2d1   :  { %v1220_v38 = vpop.eup %872 }
 0x2d2   :  { %v488_v40 = vsel %vm160_vm1, %v1220_v38, 0.0  ;;  %v875_v41 = vpop.eup %874 }
 0x2d3   :  { %v877_v42 = vpop.eup %876  ;;  %v368_v44 = vsel %vm160_vm1, %v875_v41, 0.0 }
 0x2d4   :  { %v1225_v43 = vpop.eup %878  ;;  %v549_v45 = vsel %vm160_vm1, %v877_v42, 0.0 }
 0x2d5   :  { %v610_v46 = vsel %vm160_vm1, %v1225_v43, 0.0 }
 0x2d8   :  { %432 = vadd.xlane.f32.xlu1 %v431_v39 }
 0x2db   :  { %489 = vadd.xlane.f32.xlu2 %v488_v40 }
 0x2e0   :  { %369 = vadd.xlane.f32.xlu1 %v368_v44 }
 0x2e3   :  { %550 = vadd.xlane.f32.xlu0 %v549_v45  ;;  %611 = vadd.xlane.f32.xlu2 %v610_v46 }
 0x2f9   :  { %616 = vrot.lane.b32.xlu1 %v1155_v17, %s1063_s10 }
 0x2fb   :  { %555 = vrot.lane.b32.xlu2 %v1155_v17, %s1064_s11 }
 0x308   :  { %v188_v47 = vpop.xlane.xlu1 %187 }
 0x309   :  { %880 = vrcp.f32 %v188_v47  ;;  %v835_v47 = vld [vmem:[#allocation9 + $0x8] sm:$0xff] }
 0x30a   :  { %674 = vmatpush.bf16.msra.mxu0 %v835_v47 }
 0x30d   :  { %v246_v48 = vpop.xlane.xlu2 %245 }
 0x30f   :  { %v881_v49 = vpop.eup %880 }
 0x310   :  { %v308_v50 = vpop.xlane.xlu0 %307  ;;  %v190_v51 = vmul.f32 %v881_v49, %v1197_v11 }
 0x311   :  { %882 = vrcp.f32 %v308_v50 }
 0x312   :  { %v191_v52 = vpack.c.bf16 %v190_v51, %v190_v51  ;;  %884 = vrcp.f32 %v246_v48  ;;  %v834_v51 = vld [vmem:[#allocation9] sm:$0xff] }
 0x313   :  { %675 = vmatpush.bf16.msra.mxu0 %v834_v51 }
 0x314   :  { %790 = vmatmul.msk.bf16.vlgmr.msra.gmra.mxu2 %vm160_vm1, %v191_v52  ;;  %v837_v52 = vld [vmem:[#allocation10 + $0x8] sm:$0xff] }
 0x315   :  { %v313_v53 = vpop.permute.xlu2 %312 }
 0x316   :  { %v318_v54 = vsel %vm197_vm2, %v313_v53, 0 }
 0x317   :  { %v883_v55 = vpop.eup %882  ;;  %327 = vmatpush.bf16.msrb.mxu1 %v318_v54 }
 0x318   :  { %v310_v56 = vmul.f32 %v883_v55, %v1205_v18  ;;  %v885_v57 = vpop.eup %884 }
 0x319   :  { %v248_v58 = vmul.f32 %v885_v57, %v1201_v15  ;;  %v839_v57 = vld [vmem:[#allocation12 + $0x8] sm:$0xff] }
 0x31a   :  { %v311_v17 = vpack.c.bf16 %v310_v56, %v310_v56  ;;  %746 = vmatpush.bf16.msra.mxu3 %v839_v57 }
 0x31b   :  { %v249_v61 = vpack.c.bf16 %v248_v58, %v248_v58 }
 0x31c   :  { %794 = vmatmul.msk.bf16.vlgmr.msrb.gmra.mxu1 %vm160_vm1, %v311_v17  ;;  %v836_v17 = vld [vmem:[#allocation10] sm:$0xff] }
 0x320   :  { %v375_v59 = vpop.permute.xlu1 %374 }
 0x321   :  { %v380_v60 = vsel %vm197_vm2, %v375_v59, 0  ;;  %v863_v59 = vld [vmem:[%s1272_s4] ss:$0 sm:$0xff]  ;;  %s1068_s4 = smov 32  }
 0x322   :  { %389 = vmatpush.bf16.msra.mxu2 %v380_v60 }
 0x323   :  { %v495_v62 = vpop.permute.xlu0 %494 }
 0x324   :  { %v500_v63 = vsel %vm197_vm2, %v495_v62, 0  ;;  %792 = vmatmul.msk.bf16.vlgmr.msrb.gmra.mxu2 %vm160_vm1, %v249_v61 }
 0x326   :  { %509 = vmatpush.bf16.msrb.mxu2 %v500_v63 }
 0x32b   :  { %v438_v0 = vpop.permute.xlu0 %437 }
 0x32c   :  { %v443_v1 = vsel %vm197_vm2, %v438_v0, 0 }
 0x32d   :  { %452 = vmatpush.bf16.msra.mxu1 %v443_v1 }
 0x34b   :  { %v433_v2 = vpop.xlane.xlu1 %432 }
 0x34c   :  { %886 = vrcp.f32 %v433_v2  ;;  %v838_v2 = vld [vmem:[#allocation12] sm:$0xff] }
 0x34d   :  { %747 = vmatpush.bf16.msra.mxu3 %v838_v2 }
 0x34e   :  { %v490_v3 = vpop.xlane.xlu2 %489 }
 0x352   :  { %v887_v6 = vpop.eup %886 }
 0x353   :  { %v435_v7 = vmul.f32 %v887_v6, %v871_v12  ;;  %v370_v8 = vpop.xlane.xlu1 %369 }
 0x354   :  { %888 = vrcp.f32 %v370_v8 }
 0x355   :  { %v436_v9 = vpack.c.bf16 %v435_v7, %v435_v7 }
 0x356   :  { %v551_v10 = vpop.xlane.xlu0 %550  ;;  %v612_v11 = vpop.xlane.xlu2 %611 }
 0x357   :  { %798 = vmatmul.msk.bf16.vlgmr.msra.gmra.mxu1 %vm160_vm1, %v436_v9  ;;  %890 = vrcp.f32 %v551_v10 }
 0x358   :  { %892 = vrcp.f32 %v490_v3 }
 0x359   :  { %894 = vrcp.f32 %v612_v11 }
 0x35a   :  { %v889_v13 = vpop.eup %888 }
 0x35b   :  { %v372_v14 = vmul.f32 %v889_v13, %v875_v41 }
 0x35d   :  { %v373_v15 = vpack.c.bf16 %v372_v14, %v372_v14  ;;  %v891_v16 = vpop.eup %890 }
 0x35e   :  { %v556_v18 = vpop.permute.xlu2 %555  ;;  %v553_v20 = vmul.f32 %v891_v16, %v877_v42  ;;  %v893_v22 = vpop.eup %892 }
 0x35f   :  { %796 = vmatmul.msk.bf16.vlgmr.msra.gmra.mxu2 %vm160_vm1, %v373_v15  ;;  %v561_v19 = vsel %vm197_vm2, %v556_v18, 0  ;;  %v492_v23 = vmul.f32 %v893_v22, %v1220_v38  ;;  %v895_v27 = vpop.eup %894 }
 0x360   :  { %570 = vmatpush.bf16.msrb.mxu1 %v561_v19  ;;  %v554_v21 = vpack.c.bf16 %v553_v20, %v553_v20  ;;  %v614_v28 = vmul.f32 %v895_v27, %v1225_v43 }
 0x361   :  { %v493_v26 = vpack.c.bf16 %v492_v23, %v492_v23 }
 0x362   :  { %v615_v29 = vpack.c.bf16 %v614_v28, %v614_v28 }
 0x364   :  { %712 = vmatpush.bf16.msra.mxu1 %v837_v52 }
 0x367   :  { %802 = vmatmul.msk.bf16.vlgmr.msrb.gmra.mxu1 %vm160_vm1, %v554_v21 }
 0x368   :  { %713 = vmatpush.bf16.msra.mxu1 %v836_v17 }
 0x36b   :  { %v617_v24 = vpop.permute.xlu1 %616 }
 0x36c   :  { %v622_v25 = vsel %vm197_vm2, %v617_v24, 0 }
 0x36d   :  { %631 = vmatpush.bf16.msra.mxu2 %v622_v25 }
 0x36f   :  { %800 = vmatmul.msk.bf16.vlgmr.msrb.gmra.mxu2 %vm160_vm1, %v493_v26 }
 0x37f   :  { %804 = vmatmul.msk.bf16.vlgmr.msra.gmra.mxu2 %vm160_vm1, %v615_v29 }
 0x397   :  { %v210_v30 = vpop.f32.mrf.mxu2 }
 0x398   :  { %214 = vst.msk [vmem:[#allocation3] sm:$0xff] %vm160_vm1, %v210_v30 }
 0x399   :  { %v329_v31 = vpop.f32.mrf.mxu1 }
 0x39a   :  { %334 = vrot.lane.b32.xlu1 %v329_v31, %s1065_s9 }
 0x39f   :  { %v212_v32 = vpop.f32.mrf.mxu2 }
 0x3a1   :  { %v331_v33 = vpop.f32.mrf.mxu1 }
 0x3a7   :  { %v267_v34 = vpop.f32.mrf.mxu2 }
 0x3a8   :  { %272 = vrot.lane.b32.xlu1 %v267_v34, %s1066_s12 }
 0x3af   :  { %v269_v35 = vpop.f32.mrf.mxu2 }
 0x3d4   :  { %v454_v12 = vpop.f32.mrf.mxu1 }
 0x3d5   :  { %458 = vst.msk [vmem:[#allocation3 + $0x8] sm:$0xff] %vm160_vm1, %v454_v12 }
 0x3dc   :  { %v456_v36 = vpop.f32.mrf.mxu1 }
 0x3e2   :  { %v391_v37 = vpop.f32.mrf.mxu2 }
 0x3e3   :  { %396 = vrot.lane.b32.xlu0 %v391_v37, %s1067_s13 }
 0x3e4   :  { %v572_v38 = vpop.f32.mrf.mxu1 }
 0x3ea   :  { %v393_v39 = vpop.f32.mrf.mxu2 }
 0x3ec   :  { %v574_v40 = vpop.f32.mrf.mxu1 }
 0x3f2   :  { %v511_v41 = vpop.f32.mrf.mxu2 }
 0x3f3   :  { %516 = vrot.lane.b32.xlu2 %v511_v41, %s1066_s12 }
 0x3fa   :  { %v513_v42 = vpop.f32.mrf.mxu2 }
 0x3fb   :  { %577 = vrot.lane.b32.xlu2 %v572_v38, %s1065_s9 }
 0x402   :  { %v633_v43 = vpop.f32.mrf.mxu2 }
 0x403   :  { %638 = vrot.lane.b32.xlu1 %v633_v43, %s1067_s13 }
 0x40a   :  { %v635_v44 = vpop.f32.mrf.mxu2 }
 0x40c   :  { %v335_v45 = vpop.permute.xlu1 %334 }
 0x41a   :  { %v273_v46 = vpop.permute.xlu1 %272 }
 0x41b   :  { %276 = vst.msk [vmem:[#allocation3] sm:$0xff] %vm275_vm3, %v273_v46 }
 0x41c   :  { %338 = vst.msk [vmem:[#allocation3] sm:$0xff] %vm337_vm4, %v335_v45 }
 0x44d   :  { %v517_v48 = vpop.permute.xlu2 %516 }
 0x44e   :  { %519 = vst.msk [vmem:[#allocation3 + $0x8] sm:$0xff] %vm275_vm3, %v517_v48 }
 0x455   :  { %v578_v49 = vpop.permute.xlu2 %577  ;;  %v397_v50 = vpop.permute.xlu0 %396 }
 0x456   :  { %580 = vst.msk [vmem:[#allocation3 + $0x8] sm:$0xff] %vm337_vm4, %v578_v49 }
 0x457   :  { %400 = vst.msk [vmem:[#allocation3] sm:$0xff] %vm399_vm5, %v397_v50 }
 0x45e   :  { %v642_v54 = vld [vmem:[#allocation3] sm:$0xff] }
 0x475   :  { %v639_v53 = vpop.permute.xlu1 %638 }
 0x476   :  { %641 = vst.msk [vmem:[#allocation3 + $0x8] sm:$0xff] %vm399_vm5, %v639_v53 }
 0x47d   :  { %v643_v55 = vld [vmem:[#allocation3 + $0x8] sm:$0xff] }
 0x47e   :  { %v644_v56 = vpack.c.bf16 %v643_v55, %v642_v54 }
 0x480   :  { %813 = vmatmul.msk.bf16.vlgmr.msra.gmra.mxu0 %vm105_vm0, %v644_v56 }
 0x4fd   :  { %v677_v58 = vpop.f32.mrf.mxu0 }
 0x4fe   :  { %v678_v60 = vadd.f32 %v863_v59, %v677_v58 }
 0x500   :  { %v684_v63 = vadd.f32 %v678_v60, %v1136_v4 }
 0x505   :  { %v679_v61 = vpop.f32.mrf.mxu0 }
 0x506   :  { %v680_v62 = vadd.f32 %v863_v59, %v679_v61 }
 0x508   :  { %v685_v0 = vadd.f32 %v680_v62, %v1138_v5 }
 0x50a   :  { %v686_v1 = vpack.c.bf16 %v685_v0, %v684_v63 }
 0x50c   :  { %822 = vmatmul.msk.bf16.vlgmr.msra.gmra.mxu1 %vm105_vm0, %v686_v1 }
 0x589   :  { %v715_v3 = vpop.f32.mrf.mxu1 }
 0x591   :  { %v717_v6 = vpop.f32.mrf.mxu1 }
 0x592   :  { %v720_v7 = vpack.c.bf16 %v717_v6, %v715_v3 }
 0x594   :  { %831 = vmatmul.msk.bf16.vlgmr.msra.gmra.mxu3 %vm105_vm0, %v720_v7 }
 0x617   :  { %v749_v8 = vpop.f32.mrf.mxu3 }
 0x618   :  { %v750_v9 = vadd.f32 %v749_v8, %v684_v63 }
 0x61a   :  { %754 = vst.msk [vmem:[#allocation13] sm:$0xff] %vm105_vm0, %v750_v9 }
 0x61f   :  { %v751_v10 = vpop.f32.mrf.mxu3 }
 0x620   :  { %v752_v11 = vadd.f32 %v751_v10, %v685_v0 }
 0x622   :  { %756 = vrot.lane.b32.xlu2 %v752_v11, %s1068_s4 }
 0x67c   :  { %v757_v4 = vpop.permute.xlu2 %756 }
 0x67d   :  { %760 = vst.msk [vmem:[#allocation13] sm:$0xff] %vm759_vm6, %v757_v4 }
 0x67e   :  { %771 = dma.vmem_to_hbm [thread:$0]  %s767_s16, 128, %s769_s18, [#allocation6]  }
 0x67f   :  { %1046 = dma.done.wait [#allocation6], 128  }
 0x680   :  { %1047 = vsyncadd [#allocation6], 4294967168 }
 0x681   :  { %776 = vsyncpa [#allocation5], 1 }
 0x682   :  { %777 = vsyncpa [#allocation8], 1 }
 0x683   :  { %778 = vsyncpa [#allocation11], 1 }
 0x684   :  { %779 = vsyncpa [#allocation6], 1 }

</bundles_post_ra>
